<compile_context>
chip_gen: v5e
topology: v5e:2x2
jax: 0.10.0
libtpu: 0.0.40
codegen_flags: <defaults>
</compile_context>

<pallas_src>
import functools

import jax
import jax.numpy as jnp
from jax.experimental import pallas as pl
from jax.experimental.pallas import tpu as pltpu

LN_EPS = 1e-5  # torch.nn.LayerNorm default eps


def _round_up(x, m):
    return ((x + m - 1) // m) * m


def _actor_trunk_kernel(obs_ref, w1_ref, w2_ref, w3_ref, vec_ref, mu_ref, *, h_true):
    """Full actor trunk (+ final tanh) for one batch tile, all resident in VMEM."""
    x = obs_ref[...]                                  # bf16 (tB, OBS_P)
    vecs = vec_ref[...]                               # f32  (8, W): b1,gamma,beta,b2,b3,...
    h_pad = w1_ref.shape[1]
    a_pad = mu_ref.shape[1]
    b1 = vecs[0:1, :h_pad]
    gamma = vecs[1:2, :h_pad]
    beta = vecs[2:3, :h_pad]
    b2 = vecs[3:4, :h_pad]
    b3 = vecs[4:5, :a_pad]

    # Layer 0: Linear -> LayerNorm -> Tanh  (bf16 MXU inputs, f32 accumulate/stats)
    h = jnp.dot(x, w1_ref[...], preferred_element_type=jnp.float32) + b1
    # Masked LayerNorm over the TRUE hidden width (padded lanes are exactly zero,
    # but they must not enter the mean / variance statistics).
    lane = jax.lax.broadcasted_iota(jnp.int32, h.shape, 1)
    mask = lane < h_true
    inv_h = 1.0 / float(h_true)
    mean = jnp.sum(jnp.where(mask, h, 0.0), axis=-1, keepdims=True) * inv_h
    centered = jnp.where(mask, h - mean, 0.0)
    var = jnp.sum(centered * centered, axis=-1, keepdims=True) * inv_h
    h = jnp.tanh(centered * jax.lax.rsqrt(var + LN_EPS) * gamma + beta)

    # Hidden layer (hidden_depth - 1 == 1 of these): Linear -> ReLU
    h = jnp.dot(h.astype(jnp.bfloat16), w2_ref[...],
                preferred_element_type=jnp.float32) + b2
    h = jnp.maximum(h, 0.0)

    # Output layer + policy tanh  (lane-dense (tB, 128) store; sliced outside)
    mu = jnp.dot(h.astype(jnp.bfloat16), w3_ref[...],
                 preferred_element_type=jnp.float32) + b3
    mu_ref[...] = jnp.tanh(mu)


def _pick_batch_tile(B):
    """Pipeline-friendly batch tile; >=2 grid steps whenever B >= 256 (v7x 2-TC)."""
    if B >= 2048:
        return 1024
    if B >= 1024:
        return 512
    if B >= 512:
        return 256
    if B >= 256:
        return 128
    return _round_up(B, 8)   # small batch: single sublane-aligned block


def pack_actor_params(w1, b1, gamma, beta, w2, b2, w3, b3):
    """One-time padding/packing: bf16 weights padded to 128-multiples, f32 vec slab."""
    obs_dim, H = w1.shape
    A = w3.shape[1]
    obs_p = _round_up(obs_dim, 128)
    h_p = _round_up(H, 128)
    a_p = _round_up(A, 128)
    w = max(h_p, a_p)
    w1_p = jnp.zeros((obs_p, h_p), jnp.bfloat16).at[:obs_dim, :H].set(w1.astype(jnp.bfloat16))
    w2_p = jnp.zeros((h_p, h_p), jnp.bfloat16).at[:H, :H].set(w2.astype(jnp.bfloat16))
    w3_p = jnp.zeros((h_p, a_p), jnp.bfloat16).at[:H, :A].set(w3.astype(jnp.bfloat16))
    vecs = jnp.zeros((8, w), jnp.float32)
    vecs = vecs.at[0, :H].set(b1).at[1, :H].set(gamma).at[2, :H].set(beta)
    vecs = vecs.at[3, :H].set(b2).at[4, :A].set(b3)
    return (w1_p, w2_p, w3_p, vecs, H, A)


def actor_forward(obs, packed, stddev):
    """obs: (B, obs_dim) f32. Returns (mu, std), each (B, act_dim) f32."""
    w1, w2, w3, vecs, h_true, act_dim = packed
    B, obs_dim = obs.shape
    obs_p_dim, h_p = w1.shape
    a_p = w3.shape[1]

    tB = _pick_batch_tile(B)
    B_P = _round_up(B, tB)

    # Pad + cast obs once in the wrapper (zero rows/cols; bf16 halves HBM traffic).
    obs_p = jnp.zeros((B_P, obs_p_dim), jnp.bfloat16)
    obs_p = obs_p.at[:B, :obs_dim].set(obs.astype(jnp.bfloat16))

    flops = 2 * B_P * (obs_p_dim * h_p + h_p * h_p + h_p * a_p)
    transcendentals = B_P * (2 * h_p + a_p)           # tanh x2, rsqrt, final tanh
    bytes_accessed = (obs_p.size * 2 + w1.size * 2 + w2.size * 2 + w3.size * 2
                      + vecs.size * 4 + B_P * a_p * 4)

    mu_p = pl.pallas_call(
        functools.partial(_actor_trunk_kernel, h_true=h_true),
        out_shape=jax.ShapeDtypeStruct((B_P, a_p), jnp.float32),
        grid_spec=pltpu.PrefetchScalarGridSpec(
            num_scalar_prefetch=0,
            grid=(B_P // tB,),
            in_specs=[
                pl.BlockSpec((tB, obs_p_dim), lambda i: (i, 0)),    # batch-tiled obs
                pl.BlockSpec((obs_p_dim, h_p), lambda i: (0, 0)),   # resident weights
                pl.BlockSpec((h_p, h_p), lambda i: (0, 0)),
                pl.BlockSpec((h_p, a_p), lambda i: (0, 0)),
                pl.BlockSpec((8, vecs.shape[1]), lambda i: (0, 0)),  # packed 1-row params
            ],
            out_specs=pl.BlockSpec((tB, a_p), lambda i: (i, 0)),     # lane-dense mu
        ),
        compiler_params=pltpu.CompilerParams(
            dimension_semantics=("parallel",),
            vmem_limit_bytes=32 * 1024 * 1024),
        cost_estimate=pl.CostEstimate(
            flops=flops, transcendentals=transcendentals, bytes_accessed=bytes_accessed),
    )(obs_p, w1, w2, w3, vecs)

    mu = mu_p[:B, :act_dim]
    std = jnp.full_like(mu, stddev)   # torch.ones_like(mu) * self.stddev
    return mu, std


def init_actor_params(key, obs_dim, hidden_dim, act_dim):
    """Deterministic synthetic init (stands in for utils.weight_init / orthogonal)."""
    ks = jax.random.split(key, 5)
    s1 = 1.0 / jnp.sqrt(jnp.float32(obs_dim))
    s2 = 1.0 / jnp.sqrt(jnp.float32(hidden_dim))
    w1 = jax.random.normal(ks[0], (obs_dim, hidden_dim), jnp.float32) * s1
    b1 = jnp.zeros((hidden_dim,), jnp.float32)
    gamma = jnp.ones((hidden_dim,), jnp.float32)    # LayerNorm gamma
    beta = jnp.zeros((hidden_dim,), jnp.float32)    # LayerNorm beta
    w2 = jax.random.normal(ks[1], (hidden_dim, hidden_dim), jnp.float32) * s2
    b2 = jax.random.normal(ks[2], (hidden_dim,), jnp.float32) * 0.01
    w3 = jax.random.normal(ks[3], (hidden_dim, act_dim), jnp.float32) * s2
    b3 = jax.random.normal(ks[4], (act_dim,), jnp.float32) * 0.01
    return (w1, b1, gamma, beta, w2, b2, w3, b3)


def _actor_ref_f32(obs, raw, stddev):
    """Pure-f32, unpadded reference (module semantics)."""
    w1, b1, gamma, beta, w2, b2, w3, b3 = raw
    h = obs @ w1 + b1
    mean = jnp.mean(h, axis=-1, keepdims=True)
    var = jnp.mean(jnp.square(h - mean), axis=-1, keepdims=True)
    h = (h - mean) / jnp.sqrt(var + LN_EPS)
    h = jnp.tanh(h * gamma + beta)
    h = jnp.maximum(h @ w2 + b2, 0.0)
    mu = jnp.tanh(h @ w3 + b3)
    return mu, jnp.full_like(mu, stddev)


def _actor_ref_bf16(obs, packed, stddev):
    """Plain-JAX reference that mirrors the kernel's padded/bf16 numerics exactly."""
    w1, w2, w3, vecs, h_true, act_dim = packed
    obs_p_dim, h_p = w1.shape
    a_p = w3.shape[1]
    B, obs_dim = obs.shape
    x = jnp.zeros((B, obs_p_dim), jnp.bfloat16).at[:, :obs_dim].set(obs.astype(jnp.bfloat16))
    b1, gamma, beta = vecs[0:1, :h_p], vecs[1:2, :h_p], vecs[2:3, :h_p]
    b2, b3 = vecs[3:4, :h_p], vecs[4:5, :a_p]
    h = jnp.dot(x, w1, preferred_element_type=jnp.float32) + b1
    mask = jnp.arange(h_p)[None, :] < h_true
    inv_h = 1.0 / float(h_true)
    mean = jnp.sum(jnp.where(mask, h, 0.0), axis=-1, keepdims=True) * inv_h
    centered = jnp.where(mask, h - mean, 0.0)
    var = jnp.sum(centered * centered, axis=-1, keepdims=True) * inv_h
    h = jnp.tanh(centered * jax.lax.rsqrt(var + LN_EPS) * gamma + beta)
    h = jnp.maximum(jnp.dot(h.astype(jnp.bfloat16), w2,
                            preferred_element_type=jnp.float32) + b2, 0.0)
    mu = jnp.tanh(jnp.dot(h.astype(jnp.bfloat16), w3,
                          preferred_element_type=jnp.float32) + b3)
    mu = mu[:, :act_dim]
    return mu, jnp.full_like(mu, stddev)


if __name__ == "__main__":
    # NOTE: at this demo size the call is launch/DMA-descriptor bound; the tiling /
    # bf16 / lane-density wins only materialize for batches in the thousands.
    B, OBS_DIM, ACT_DIM, HIDDEN = 8, 24, 8, 32   # hidden_depth = 2 (fixed in kernel)
    STDDEV = 0.2

    key = jax.random.PRNGKey(0)
    k_obs, k_params = jax.random.split(key, 2)
    obs = jax.random.normal(k_obs, (B, OBS_DIM), jnp.float32)
    raw = init_actor_params(k_params, OBS_DIM, HIDDEN, ACT_DIM)
    packed = pack_actor_params(*raw)

    mu, std = actor_forward(obs, packed, STDDEV)
    jax.block_until_ready((mu, std))

    # correctness checks
    mu_ref, std_ref = _actor_ref_bf16(obs, packed, STDDEV)   # same numeric path
    mu_f32, _ = _actor_ref_f32(obs, raw, STDDEV)             # module-semantics path
    assert mu.shape == (B, ACT_DIM) and std.shape == (B, ACT_DIM)
    assert jnp.allclose(mu, mu_ref, atol=1e-3, rtol=1e-3)
    assert jnp.allclose(mu, mu_f32, atol=5e-2, rtol=5e-2)
    assert jnp.allclose(std, std_ref)
    assert bool(jnp.all(jnp.abs(mu) <= 1.0))   # tanh-squashed mean

    print("KERNEL_OK")
</pallas_src>

<mosaic_0001>
module attributes {stable_mosaic.version = 11 : i64} {
  func.func @_actor_trunk_kernel(%arg0: i32, %arg1: memref<8x128xbf16, #tpu.memory_space<vmem>>, %arg2: memref<128x128xbf16, #tpu.memory_space<vmem>>, %arg3: memref<128x128xbf16, #tpu.memory_space<vmem>>, %arg4: memref<128x128xbf16, #tpu.memory_space<vmem>>, %arg5: memref<8x128xf32, #tpu.memory_space<vmem>>, %arg6: memref<8x128xf32, #tpu.memory_space<vmem>>) attributes {dimension_semantics = [#tpu.dimension_semantics<parallel>], iteration_bounds = array<i64: 1>, scalar_prefetch = 0 : i64, scratch_operands = 0 : i64, tpu.core_type = #tpu.core_type<tc>, window_params = [{transform_indices = @transform_0, window_bounds = array<i64: 8, 128>}, {pipeline_mode = #tpu.pipeline_mode<synchronous>, transform_indices = @transform_1, window_bounds = array<i64: 128, 128>}, {pipeline_mode = #tpu.pipeline_mode<synchronous>, transform_indices = @transform_2, window_bounds = array<i64: 128, 128>}, {pipeline_mode = #tpu.pipeline_mode<synchronous>, transform_indices = @transform_3, window_bounds = array<i64: 128, 128>}, {pipeline_mode = #tpu.pipeline_mode<synchronous>, transform_indices = @transform_4, window_bounds = array<i64: 8, 128>}, {transform_indices = @transform_5, window_bounds = array<i64: 8, 128>}]} {
    %c0 = arith.constant 0 : index
    %c0_0 = arith.constant 0 : index
    %0 = vector.load %arg1[%c0, %c0_0] : memref<8x128xbf16, #tpu.memory_space<vmem>>, vector<8x128xbf16>
    %c0_1 = arith.constant 0 : index
    %c0_2 = arith.constant 0 : index
    %1 = vector.load %arg5[%c0_1, %c0_2] : memref<8x128xf32, #tpu.memory_space<vmem>>, vector<8x128xf32>
    %2 = vector.extract_strided_slice %1 {offsets = [0, 0], sizes = [1, 128], strides = [1, 1]} : vector<8x128xf32> to vector<1x128xf32>
    %3 = vector.extract_strided_slice %1 {offsets = [1, 0], sizes = [1, 128], strides = [1, 1]} : vector<8x128xf32> to vector<1x128xf32>
    %4 = vector.extract_strided_slice %1 {offsets = [2, 0], sizes = [1, 128], strides = [1, 1]} : vector<8x128xf32> to vector<1x128xf32>
    %5 = vector.extract_strided_slice %1 {offsets = [3, 0], sizes = [1, 128], strides = [1, 1]} : vector<8x128xf32> to vector<1x128xf32>
    %6 = vector.extract_strided_slice %1 {offsets = [4, 0], sizes = [1, 128], strides = [1, 1]} : vector<8x128xf32> to vector<1x128xf32>
    %c0_3 = arith.constant 0 : index
    %c0_4 = arith.constant 0 : index
    %7 = vector.load %arg2[%c0_3, %c0_4] : memref<128x128xbf16, #tpu.memory_space<vmem>>, vector<128x128xbf16>
    %cst = arith.constant dense<0.000000e+00> : vector<8x128xf32>
    %8 = tpu.matmul %0, %7, %cst {dimension_numbers = #tpu.dot_dimension_numbers<[1], [0], [0], [1], [0, 0, 1, 1], [], []>} : vector<8x128xbf16>, vector<128x128xbf16>, vector<8x128xf32> -> vector<8x128xf32>
    %9 = vector.broadcast %2 : vector<1x128xf32> to vector<8x128xf32>
    %10 = arith.addf %8, %9 : vector<8x128xf32>
    %11 = tpu.iota {dimensions = array<i32: 1>} : vector<8x128xi32>
    %c32_i32 = arith.constant 32 : i32
    %12 = vector.broadcast %c32_i32 : i32 to vector<8x128xi32>
    %13 = arith.cmpi slt, %11, %12 : vector<8x128xi32>
    %cst_5 = arith.constant 0.000000e+00 : f32
    %14 = vector.broadcast %cst_5 : f32 to vector<8x128xf32>
    %15 = arith.select %13, %10, %14 : vector<8x128xi1>, vector<8x128xf32>
    %cst_6 = arith.constant dense<0.000000e+00> : vector<8xf32>
    %16 = vector.multi_reduction <add>, %15, %cst_6 [1] : vector<8x128xf32> to vector<8xf32>
    %17 = vector.shape_cast %16 : vector<8xf32> to vector<8x1xf32>
    %cst_7 = arith.constant 3.125000e-02 : f32
    %18 = vector.broadcast %cst_7 : f32 to vector<8x1xf32>
    %19 = arith.mulf %17, %18 : vector<8x1xf32>
    %20 = vector.broadcast %19 : vector<8x1xf32> to vector<8x128xf32>
    %21 = arith.subf %10, %20 : vector<8x128xf32>
    %cst_8 = arith.constant 0.000000e+00 : f32
    %22 = vector.broadcast %cst_8 : f32 to vector<8x128xf32>
    %23 = arith.select %13, %21, %22 : vector<8x128xi1>, vector<8x128xf32>
    %24 = arith.mulf %23, %23 : vector<8x128xf32>
    %cst_9 = arith.constant dense<0.000000e+00> : vector<8xf32>
    %25 = vector.multi_reduction <add>, %24, %cst_9 [1] : vector<8x128xf32> to vector<8xf32>
    %26 = vector.shape_cast %25 : vector<8xf32> to vector<8x1xf32>
    %cst_10 = arith.constant 3.125000e-02 : f32
    %27 = vector.broadcast %cst_10 : f32 to vector<8x1xf32>
    %28 = arith.mulf %26, %27 : vector<8x1xf32>
    %cst_11 = arith.constant 9.99999974E-6 : f32
    %29 = vector.broadcast %cst_11 : f32 to vector<8x1xf32>
    %30 = arith.addf %28, %29 : vector<8x1xf32>
    %31 = math.rsqrt %30 : vector<8x1xf32>
    %32 = vector.broadcast %31 : vector<8x1xf32> to vector<8x128xf32>
    %33 = arith.mulf %23, %32 : vector<8x128xf32>
    %34 = vector.broadcast %3 : vector<1x128xf32> to vector<8x128xf32>
    %35 = arith.mulf %33, %34 : vector<8x128xf32>
    %36 = vector.broadcast %4 : vector<1x128xf32> to vector<8x128xf32>
    %37 = arith.addf %35, %36 : vector<8x128xf32>
    %38 = math.tanh %37 : vector<8x128xf32>
    %39 = arith.truncf %38 : vector<8x128xf32> to vector<8x128xbf16>
    %c0_12 = arith.constant 0 : index
    %c0_13 = arith.constant 0 : index
    %40 = vector.load %arg3[%c0_12, %c0_13] : memref<128x128xbf16, #tpu.memory_space<vmem>>, vector<128x128xbf16>
    %cst_14 = arith.constant dense<0.000000e+00> : vector<8x128xf32>
    %41 = tpu.matmul %39, %40, %cst_14 {dimension_numbers = #tpu.dot_dimension_numbers<[1], [0], [0], [1], [0, 0, 1, 1], [], []>} : vector<8x128xbf16>, vector<128x128xbf16>, vector<8x128xf32> -> vector<8x128xf32>
    %42 = vector.broadcast %5 : vector<1x128xf32> to vector<8x128xf32>
    %43 = arith.addf %41, %42 : vector<8x128xf32>
    %cst_15 = arith.constant 0.000000e+00 : f32
    %44 = vector.broadcast %cst_15 : f32 to vector<8x128xf32>
    %45 = arith.maximumf %43, %44 : vector<8x128xf32>
    %46 = arith.truncf %45 : vector<8x128xf32> to vector<8x128xbf16>
    %c0_16 = arith.constant 0 : index
    %c0_17 = arith.constant 0 : index
    %47 = vector.load %arg4[%c0_16, %c0_17] : memref<128x128xbf16, #tpu.memory_space<vmem>>, vector<128x128xbf16>
    %cst_18 = arith.constant dense<0.000000e+00> : vector<8x128xf32>
    %48 = tpu.matmul %46, %47, %cst_18 {dimension_numbers = #tpu.dot_dimension_numbers<[1], [0], [0], [1], [0, 0, 1, 1], [], []>} : vector<8x128xbf16>, vector<128x128xbf16>, vector<8x128xf32> -> vector<8x128xf32>
    %49 = vector.broadcast %6 : vector<1x128xf32> to vector<8x128xf32>
    %50 = arith.addf %48, %49 : vector<8x128xf32>
    %51 = math.tanh %50 : vector<8x128xf32>
    %c0_19 = arith.constant 0 : index
    %c0_20 = arith.constant 0 : index
    %52 = vector.load %arg6[%c0_19, %c0_20] : memref<8x128xf32, #tpu.memory_space<vmem>>, vector<8x128xf32>
    tpu.vector_store %arg6[%c0_19, %c0_20], %51 {strides = array<i32>} : memref<8x128xf32, #tpu.memory_space<vmem>>, vector<8x128xf32>,
    return
  }
  func.func @transform_0(%arg0: i32) -> (i32, i32) {
    %c0_i32 = arith.constant 0 : i32
    %c0_i32_0 = arith.constant 0 : i32
    return %arg0, %c0_i32 : i32, i32
  }
  func.func @transform_1(%arg0: i32) -> (i32, i32) {
    %c0_i32 = arith.constant 0 : i32
    %c0_i32_0 = arith.constant 0 : i32
    %c0_i32_1 = arith.constant 0 : i32
    return %c0_i32, %c0_i32_0 : i32, i32
  }
  func.func @transform_2(%arg0: i32) -> (i32, i32) {
    %c0_i32 = arith.constant 0 : i32
    %c0_i32_0 = arith.constant 0 : i32
    %c0_i32_1 = arith.constant 0 : i32
    return %c0_i32, %c0_i32_0 : i32, i32
  }
  func.func @transform_3(%arg0: i32) -> (i32, i32) {
    %c0_i32 = arith.constant 0 : i32
    %c0_i32_0 = arith.constant 0 : i32
    %c0_i32_1 = arith.constant 0 : i32
    return %c0_i32, %c0_i32_0 : i32, i32
  }
  func.func @transform_4(%arg0: i32) -> (i32, i32) {
    %c0_i32 = arith.constant 0 : i32
    %c0_i32_0 = arith.constant 0 : i32
    %c0_i32_1 = arith.constant 0 : i32
    return %c0_i32, %c0_i32_0 : i32, i32
  }
  func.func @transform_5(%arg0: i32) -> (i32, i32) {
    %c0_i32 = arith.constant 0 : i32
    %c0_i32_0 = arith.constant 0 : i32
    return %arg0, %c0_i32 : i32, i32
  }
}

</mosaic_0001>

<bundles_post_ra>
// kernel: tpu_custom_call.1
= control target key start
LH: loop header
LB: loop body
LE: loop exit
PB: predicated region body
PF: predicated region fallthrough
CT: control target
= control target key end

     0   :  { %10 = vsyncpa [#allocation3], 0  ;;  %s734_s0 = inlined_call_operand.hbm [shape: bf16[8,128], index: 0, kind: input, shape index: {}]   ;;  %s735_s1 = inlined_call_operand.hbm [shape: bf16[128,128], index: 1, kind: input, shape index: {}]   ;;  %s736_s2 = inlined_call_operand.hbm [shape: bf16[128,128], index: 2, kind: input, shape index: {}]   ;;  %s737_s3 = inlined_call_operand.hbm [shape: bf16[128,128], index: 3, kind: input, shape index: {}]   ;;  %s738_s4 = inlined_call_operand.hbm [shape: f32[8,128], index: 4, kind: input, shape index: {}]   ;;  %s739_s5 = inlined_call_operand.hbm [shape: f32[8,128], index: 5, kind: output, shape index: {}]  }
   0x1   :  { %11 = vsyncpa [#allocation6], 0 }
   0x2   :  { %12 = vsyncpa [#allocation9], 0  ;;  %s29_s20 = sshll.u32 %s735_s1, 4  ;;  %s30_s20 = int_to_ptr.hbm [resolvable:$true] %s29_s20 }
   0x3   :  { %13 = vsyncpa [#allocation4], 0  ;;  %s671_s21 = smov [#allocation5]   ;;  %s55_s25 = sshll.u32 %s737_s3, 4  ;;  %s56_s25 = int_to_ptr.hbm [resolvable:$true] %s55_s25 }
   0x4   :  { %s31_s22 = sshll.u32 %s671_s21, 4  ;;  %s672_s26 = smov 64   ;;  %s32_s22 = int_to_ptr.vmem [resolvable:$true] %s31_s22 }
   0x5   :  { %s673_s27 = smov 4   ;;  %s674_s28 = smov [#allocation8]  }
   0x6   :  { %37 = dma.hbm_to_vmem [thread:$0]  %s30_s20, 1024, %s32_s22, [#allocation6], %s672_s26, %s672_s26, %s673_s27  }
   0x7   :  { %s57_s29 = sshll.u32 %s674_s28, 4  ;;  %s19_s7 = sshll.u32 %s734_s0, 4  ;;  %s58_s29 = int_to_ptr.vmem [resolvable:$true] %s57_s29  ;;  %s20_s7 = int_to_ptr.hbm [resolvable:$true] %s19_s7 }
   0x8   :  { %63 = dma.hbm_to_vmem [thread:$0]  %s56_s25, 1024, %s58_s29, [#allocation9], %s672_s26, %s672_s26, %s673_s27  }
   0x9   :  { %s42_s9 = sshll.u32 %s736_s2, 4  ;;  %s675_s10 = smov [#allocation2]   ;;  %s43_s9 = int_to_ptr.hbm [resolvable:$true] %s42_s9 }
   0xa   :  { %s21_s11 = sshll.u32 %s675_s10, 4  ;;  %s676_s3 = smov [#allocation7]   ;;  %s22_s11 = int_to_ptr.vmem [resolvable:$true] %s21_s11 }
   0xb   :  { %24 = dma.hbm_to_vmem [thread:$0]  %s20_s7, 64, %s22_s11, [#allocation3]  }
   0xc   :  { %s44_s12 = sshll.u32 %s676_s3, 4  ;;  %s69_s15 = sshll.u32 %s738_s4, 4  ;;  %s45_s12 = int_to_ptr.vmem [resolvable:$true] %s44_s12  ;;  %s70_s15 = int_to_ptr.hbm [resolvable:$true] %s69_s15 }
   0xd   :  { %50 = dma.hbm_to_vmem [thread:$0]  %s43_s9, 1024, %s45_s12, [#allocation6], %s672_s26, %s672_s26, %s673_s27  }
   0xe   :  { %s677_s0 = smov [#allocation10]  }
   0xf   :  { %s71_s16 = sshll.u32 %s677_s0, 4  ;;  %s72_s16 = int_to_ptr.vmem [resolvable:$true] %s71_s16 }
  0x10   :  { %74 = dma.hbm_to_vmem [thread:$0]  %s70_s15, 128, %s72_s16, [#allocation9]  }
  0x11   :  { %663 = dma.done.wait [#allocation3], 64  }
  0x12   :  { %664 = vsyncadd [#allocation3], 4294967232 }
  0x13   :  { %665 = dma.done.wait [#allocation6], 2048  }
  0x14   :  { %666 = vsyncadd [#allocation6], 4294965248 }
  0x15   :  { %667 = dma.done.wait [#allocation9], 1152  }
  0x16   :  { %668 = vsyncadd [#allocation9], 4294966144  ;;  %v488_v0 = vld [vmem:[#allocation5 + $0x38] sm:$0xff]  ;;  %v487_v1 = vld [vmem:[#allocation5 + $0x30] sm:$0xff]  ;;  %v175_v9 = vlaneseq  ;;  %s678_s2 = smov [#allocation11]   ;;  %s373_s19 = sshll.u32 %s739_s5, 4  ;;  %s374_s19 = int_to_ptr.hbm [resolvable:$true] %s373_s19 }
  0x17   :  { %162 = vmatpush.bf16.msra.mxu0 %v488_v0  ;;  %v486_v2 = vld [vmem:[#allocation5 + $0x28] sm:$0xff]  ;;  %v485_v3 = vld [vmem:[#allocation5 + $0x20] sm:$0xff]  ;;  %v484_v4 = vld [vmem:[#allocation5 + $0x18] sm:$0xff]  ;;  %s371_s4 = sshll.u32 %s678_s2, 4  ;;  %s372_s4 = int_to_ptr.vmem [resolvable:$true] %s371_s4 }
  0x18   :  { %v483_v5 = vld [vmem:[#allocation5 + $0x10] sm:$0xff]  ;;  %v482_v6 = vld [vmem:[#allocation5 + $0x8] sm:$0xff]  ;;  %v481_v7 = vld [vmem:[#allocation5] sm:$0xff]  ;;  %v176_v11 = vand.u32 127, %v175_v9 }
  0x19   :  { %v95_v8 = vld [vmem:[#allocation2] sm:$0xf]  ;;  %v724_v10 = vld [vmem:[#allocation10] sm:$0xff]  ;;  %v495_v23 = vld [vmem:[#allocation7 + $0x30] sm:$0xff] }
  0x1a   :  { %v113_v12 = vperm.slane %v724_v10, 0  ;;  %vm177_vm0 = vcmp.lt.s32.totalorder %v176_v11, 32  ;;  %v496_v22 = vld [vmem:[#allocation7 + $0x38] sm:$0xff]  ;;  %v494_v24 = vld [vmem:[#allocation7 + $0x28] sm:$0xff]  ;;  %v493_v25 = vld [vmem:[#allocation7 + $0x20] sm:$0xff]  ;;  %v200_v44 = vperm.slane %v724_v10, 1 }
  0x1b   :  { %163 = vmatpush.bf16.msra.mxu0 %v487_v1  ;;  %271 = vmatpush.bf16.msra.mxu1 %v496_v22  ;;  %v492_v26 = vld [vmem:[#allocation7 + $0x18] sm:$0xff]  ;;  %v491_v27 = vld [vmem:[#allocation7 + $0x10] sm:$0xff]  ;;  %v490_v28 = vld [vmem:[#allocation7 + $0x8] sm:$0xff]  ;;  %v202_v47 = vperm.slane %v724_v10, 2  ;;  %v222_v55 = vperm.slane %v724_v10, 3  ;;  %v302_v61 = vperm.slane %v724_v10, 4 }
  0x1c   :  { %v489_v29 = vld [vmem:[#allocation7] sm:$0xff]  ;;  %v504_v33 = vld [vmem:[#allocation8 + $0x38] sm:$0xff]  ;;  %v503_v34 = vld [vmem:[#allocation8 + $0x30] sm:$0xff] }
  0x1d   :  { %351 = vmatpush.bf16.msra.mxu2 %v504_v33  ;;  %v502_v37 = vld [vmem:[#allocation8 + $0x28] sm:$0xff]  ;;  %v501_v40 = vld [vmem:[#allocation8 + $0x20] sm:$0xff]  ;;  %v500_v43 = vld [vmem:[#allocation8 + $0x18] sm:$0xff] }
  0x1e   :  { %v499_v48 = vld [vmem:[#allocation8 + $0x10] sm:$0xff]  ;;  %v498_v53 = vld [vmem:[#allocation8 + $0x8] sm:$0xff]  ;;  %v497_v54 = vld [vmem:[#allocation8] sm:$0xff] }
  0x1f   :  { %164 = vmatpush.bf16.msra.mxu0 %v486_v2  ;;  %272 = vmatpush.bf16.msra.mxu1 %v495_v23 }
  0x21   :  { %352 = vmatpush.bf16.msra.mxu2 %v503_v34 }
  0x23   :  { %165 = vmatpush.bf16.msra.mxu0 %v485_v3  ;;  %273 = vmatpush.bf16.msra.mxu1 %v494_v24 }
  0x25   :  { %353 = vmatpush.bf16.msra.mxu2 %v502_v37 }
  0x27   :  { %166 = vmatpush.bf16.msra.mxu0 %v484_v4  ;;  %274 = vmatpush.bf16.msra.mxu1 %v493_v25 }
  0x29   :  { %354 = vmatpush.bf16.msra.mxu2 %v501_v40 }
  0x2b   :  { %167 = vmatpush.bf16.msra.mxu0 %v483_v5  ;;  %275 = vmatpush.bf16.msra.mxu1 %v492_v26 }
  0x2d   :  { %355 = vmatpush.bf16.msra.mxu2 %v500_v43 }
  0x2f   :  { %168 = vmatpush.bf16.msra.mxu0 %v482_v6  ;;  %276 = vmatpush.bf16.msra.mxu1 %v491_v27 }
  0x31   :  { %356 = vmatpush.bf16.msra.mxu2 %v499_v48 }
  0x33   :  { %169 = vmatpush.bf16.msra.mxu0 %v481_v7  ;;  %277 = vmatpush.bf16.msra.mxu1 %v490_v28 }
  0x35   :  { %357 = vmatpush.bf16.msra.mxu2 %v498_v53 }
  0x36   :  { %170 = vmatmul.bf16.vlgmr.msra.gmra.mxu0 %v95_v8 }
  0x37   :  { %278 = vmatpush.bf16.msra.mxu1 %v489_v29 }
  0x39   :  { %358 = vmatpush.bf16.msra.mxu2 %v497_v54 }
  0xb3   :  { %v171_v13 = vpop.f32.mrf.mxu0 }
  0xb4   :  { %v172_v14 = vadd.f32 %v171_v13, %v113_v12 }
  0xb6   :  { %v178_v15 = vsel %vm177_vm0, %v172_v14, 0.0 }
  0xb7   :  { %179 = vadd.xlane.f32.xlu0 %v178_v15 }
  0xbb   :  { %v173_v16 = vpop.f32.mrf.mxu0 }
 0x12a   :  { %v180_v17 = vpop.xlane.xlu0 %179 }
 0x12b   :  { %v181_v18 = vmul.f32 0.03125, %v180_v17 }
 0x12d   :  { %v182_v19 = vsub.f32 %v172_v14, %v181_v18 }
 0x12f   :  { %v183_v20 = vsel %vm177_vm0, %v182_v19, 0.0 }
 0x130   :  { %v184_v21 = vmul.f32 %v183_v20, %v183_v20 }
 0x132   :  { %185 = vadd.xlane.f32.xlu0 %v184_v21 }
 0x1a5   :  { %v186_v30 = vpop.xlane.xlu0 %185 }
 0x1a6   :  { %v187_v31 = vmul.f32 0.03125, %v186_v30 }
 0x1a8   :  { %v188_v32 = vadd.f32 1e-05, %v187_v31 }
 0x1aa   :  { %513 = vrsqrt.f32 %v188_v32  ;;  %vm195_vm2 = vweird.f32 %v188_v32 }
 0x1b0   :  { %v514_v35 = vpop.eup %513 }
 0x1b1   :  { %v190_v36 = vmul.f32 %v514_v35, %v188_v32  ;;  %vm196_vm1 = vweird.f32 %v514_v35 }
 0x1b2   :  { %vm197_vm3 = vmor %vm195_vm2, %vm196_vm1 }
 0x1b3   :  { %v191_v38 = vmul.f32 %v514_v35, %v190_v36 }
 0x1b5   :  { %v192_v39 = vmul.f32 0.5, %v191_v38 }
 0x1b7   :  { %v193_v41 = vsub.f32 1.5, %v192_v39 }
 0x1b9   :  { %v194_v42 = vmul.f32 %v514_v35, %v193_v41 }
 0x1bb   :  { %v198_v45 = vsel %vm197_vm3, %v514_v35, %v194_v42 }
 0x1bc   :  { %v199_v46 = vmul.f32 %v198_v45, %v183_v20 }
 0x1be   :  { %v201_v49 = vmul.f32 %v200_v44, %v199_v46 }
 0x1c0   :  { %v203_v50 = vadd.f32 %v202_v47, %v201_v49 }
 0x1c2   :  { %515 = vtanh.f32 %v203_v50 }
 0x1c8   :  { %v516_v51 = vpop.eup %515 }
 0x1c9   :  { %v205_v52 = vpack.c.bf16 %v516_v51, %v516_v51 }
 0x1cb   :  { %279 = vmatmul.bf16.vlgmr.msra.gmra.mxu1 %v205_v52 }
 0x248   :  { %v280_v56 = vpop.f32.mrf.mxu1 }
 0x249   :  { %v281_v57 = vadd.f32 %v280_v56, %v222_v55 }
 0x24b   :  { %v284_v58 = vmax.f32 %v281_v57, 0.0 }
 0x24d   :  { %v285_v59 = vpack.c.bf16 %v284_v58, %v284_v58 }
 0x24f   :  { %359 = vmatmul.bf16.vlgmr.msra.gmra.mxu2 %v285_v59 }
 0x250   :  { %v282_v60 = vpop.f32.mrf.mxu1 }
 0x2d2   :  { %v360_v62 = vpop.f32.mrf.mxu2 }
 0x2d3   :  { %v361_v63 = vadd.f32 %v360_v62, %v302_v61 }
 0x2d5   :  { %517 = vtanh.f32 %v361_v63 }
 0x2da   :  { %v362_v0 = vpop.f32.mrf.mxu2 }
 0x2db   :  { %v518_v1 = vpop.eup %517 }
 0x2dc   :  { %365 = vst [vmem:[#allocation11] sm:$0xff] %v518_v1 }
 0x2dd   :  { %376 = dma.vmem_to_hbm [thread:$0]  %s372_s4, 128, %s374_s19, [#allocation4]  }
 0x2de   :  { %669 = dma.done.wait [#allocation4], 128  }
 0x2df   :  { %670 = vsyncadd [#allocation4], 4294967168 }
 0x2e0   :  { %381 = vsyncpa [#allocation3], 1 }
 0x2e1   :  { %382 = vsyncpa [#allocation6], 1 }
 0x2e2   :  { %383 = vsyncpa [#allocation9], 1 }
 0x2e3   :  { %384 = vsyncpa [#allocation4], 1 }

</bundles_post_ra>
